<compile_context>
chip_gen: v7x
topology: tpu7x:2x2x1
jax: 0.10.0
libtpu: 0.0.40
codegen_flags: <defaults>
</compile_context>

<pallas_src>
import math
import jax
import jax.numpy as jnp
from jax.experimental import pallas as pl
from jax.experimental.pallas import tpu as pltpu

HIDDEN = 10          # fixed by the module: fc1: channel -> 10
HIDDEN_PAD = 128     # hidden padded to one lane width (weights only; exact)
LANE = 128


def _round_up(n, m):
    return ((n + m - 1) // m) * m


def _mlp_kernel(x_ref, w1_ref, b1_ref, w2_ref, b2_ref, o_ref):
    # x_ref:  (TM, C)       w1_ref: (C, Hp)    b1_ref: (1, Hp)
    # w2_ref: (Hp, C)       b2_ref: (1, C)     o_ref:  (TM, C)
    x = x_ref[...]

    # fc1 on the MXU, f32 accumulation (no operand upcast; bf16 params would
    # hit the native bf16 MXU path).
    h = jnp.dot(x, w1_ref[...], preferred_element_type=jnp.float32)
    h = h + b1_ref[...].astype(jnp.float32)

    # Exact GELU (PyTorch nn.GELU() default): 0.5*h*(1+erf(h/sqrt(2))), in f32.
    h = 0.5 * h * (1.0 + jax.lax.erf(h * jnp.float32(1.0 / math.sqrt(2.0))))

    # fc2: intermediate cast to the weight dtype (bf16 MXU path for bf16
    # params), accumulate in f32.
    y = jnp.dot(h.astype(w2_ref.dtype), w2_ref[...],
                preferred_element_type=jnp.float32)
    y = y + b2_ref[...].astype(jnp.float32)

    # ReLU + store (ragged last M-tile is masked by Pallas on writeback).
    o_ref[...] = jnp.maximum(y, 0.0).astype(o_ref.dtype)


def prepare_params(w1, b1, w2, b2):
    """One-time weight prep: transpose to row-major matmul layout and zero-pad
    ONLY the hidden axis (10 -> 128).  The channel axis is left unpadded so the
    per-call activation DMAs carry no padding bytes."""
    hidden, channel = w1.shape
    assert hidden == HIDDEN and w2.shape == (channel, HIDDEN)
    w1_t = jnp.zeros((channel, HIDDEN_PAD), w1.dtype).at[:, :HIDDEN].set(w1.T)
    b1_p = jnp.zeros((1, HIDDEN_PAD), b1.dtype).at[0, :HIDDEN].set(b1)
    w2_t = jnp.zeros((HIDDEN_PAD, channel), w2.dtype).at[:HIDDEN, :].set(w2.T)
    b2_p = b2.reshape(1, channel)
    return (w1_t, b1_p, w2_t, b2_p, channel)


def _vmem_limit_bytes():
    """Per-generation scoped-VMEM limit: ~60% of physical VMEM (v5e/v6e: 128 MiB,
    v7x: 64 MiB per TC); conservative fallback if the query is unavailable."""
    try:
        info = pltpu.get_tpu_info()
        cap = int(getattr(info, "vmem_capacity_bytes", 64 * 1024 * 1024))
    except Exception:
        cap = 64 * 1024 * 1024
    return max(16 * 1024 * 1024, int(cap * 0.6))


def dist_mlp_forward(x, prepared, *,
                     target_tile_bytes=4 * 1024 * 1024,
                     min_tile_bytes=1 * 1024 * 1024,
                     min_grid_steps=8):
    """Forward pass of dist_MLP.  x: (..., channel); returns same shape/dtype."""
    w1_t, b1_p, w2_t, b2_p, channel = prepared
    assert x.shape[-1] == channel
    lead = x.shape[:-1]
    m = math.prod(lead) if lead else 1
    x_item = jnp.dtype(x.dtype).itemsize
    p_item = jnp.dtype(w1_t.dtype).itemsize

    # Packed-sublane granule of the activation dtype: 8 (f32) / 16 (bf16) / 32 (i8).
    gran = max(8, 32 // x_item)

    # VMEM budget: scoped limit minus the (double-buffered) resident weights
    # and slack for compiler-internal scratch.
    vmem_limit = _vmem_limit_bytes()
    weight_bytes = (w1_t.size + b1_p.size + w2_t.size + b2_p.size) * p_item
    act_budget = vmem_limit - 2 * weight_bytes - 4 * 1024 * 1024
    # TODO(synk): mark the grid-invariant weight/bias specs with
    # pipeline_mode=pl.Buffered(1) to reclaim their second buffer.

    row_bytes = channel * x_item
    # Big tiles amortize the ~0.35 us per-grid-step overhead ...
    tm_target = _round_up(pl.cdiv(target_tile_bytes, row_bytes), gran)
    tm_floor = _round_up(pl.cdiv(min_tile_bytes, row_bytes), gran)
    # ... double-buffered in+out activation tiles must fit the budget ...
    tm_vmem = max(gran, (act_budget // (4 * row_bytes)) // gran * gran)
    # ... and keep >= min_grid_steps grid steps so multi-TC chips (v7x)
    # can shard the "parallel" axis, but never shrink tiles below the floor.
    tm_steps = _round_up(pl.cdiv(m, min_grid_steps), gran)

    tm = min(tm_target, tm_vmem)
    tm = min(tm, max(tm_floor, tm_steps))
    tm = max(gran, min(tm, _round_up(m, gran)))
    grid_m = pl.cdiv(m, tm)

    # Advisory cost: executed (padded-hidden) FLOPs/transcendentals, real bytes.
    cost = pl.CostEstimate(
        flops=4 * m * channel * HIDDEN_PAD,
        transcendentals=m * HIDDEN_PAD,
        bytes_accessed=2 * grid_m * tm * row_bytes + weight_bytes,
    )

    x2d = x.reshape(m, channel)   # contiguous reshape: no copy, no padding

    out2d = pl.pallas_call(
        _mlp_kernel,
        out_shape=jax.ShapeDtypeStruct((m, channel), x.dtype),
        grid=(grid_m,),
        in_specs=[
            pl.BlockSpec((tm, channel), lambda i: (i, 0)),           # x tile (pipelined)
            pl.BlockSpec((channel, HIDDEN_PAD), lambda i: (0, 0)),   # W1^T (VMEM resident)
            pl.BlockSpec((1, HIDDEN_PAD), lambda i: (0, 0)),         # b1
            pl.BlockSpec((HIDDEN_PAD, channel), lambda i: (0, 0)),   # W2^T
            pl.BlockSpec((1, channel), lambda i: (0, 0)),            # b2
        ],
        out_specs=pl.BlockSpec((tm, channel), lambda i: (i, 0)),
        compiler_params=pltpu.CompilerParams(
            dimension_semantics=("parallel",),
            vmem_limit_bytes=int(vmem_limit),
        ),
        cost_estimate=cost,
    )(x2d, w1_t, b1_p, w2_t, b2_p)

    return out2d.reshape(*lead, channel)


def init_params(key, channel):
    """Deterministic init mimicking PyTorch nn.Linear default U(-1/sqrt(fan_in), ...)."""
    k1, k2, k3, k4 = jax.random.split(key, 4)
    bound1 = 1.0 / math.sqrt(channel)
    bound2 = 1.0 / math.sqrt(HIDDEN)
    w1 = jax.random.uniform(k1, (HIDDEN, channel), jnp.float32, -bound1, bound1)
    b1 = jax.random.uniform(k2, (HIDDEN,), jnp.float32, -bound1, bound1)
    w2 = jax.random.uniform(k3, (channel, HIDDEN), jnp.float32, -bound2, bound2)
    b2 = jax.random.uniform(k4, (channel,), jnp.float32, -bound2, bound2)
    return w1, b1, w2, b2


if __name__ == "__main__":
    key = jax.random.PRNGKey(0)
    k_x, k_p = jax.random.split(key)

    batch, seq, channel = 2, 8, 32
    x = jax.random.normal(k_x, (batch, seq, channel), jnp.float32)
    w1, b1, w2, b2 = init_params(k_p, channel)

    prepared = prepare_params(w1, b1, w2, b2)   # one-time weight prep
    out = dist_mlp_forward(x, prepared)
    out = jax.block_until_ready(out)

    # Pure-JAX reference (exact-erf GELU, same as PyTorch nn.GELU default).
    h_ref = x @ w1.T + b1
    h_ref = 0.5 * h_ref * (1.0 + jax.lax.erf(h_ref / jnp.sqrt(2.0)))
    y_ref = jnp.maximum(h_ref @ w2.T + b2, 0.0)

    assert out.shape == x.shape and out.dtype == x.dtype
    assert jnp.allclose(out, y_ref, atol=1e-5, rtol=1e-5)

    print("KERNEL_OK")
</pallas_src>

<mosaic_0001>
module attributes {stable_mosaic.version = 11 : i64} {
  func.func @_mlp_kernel(%arg0: i32, %arg1: memref<16x32xf32, #tpu.memory_space<vmem>>, %arg2: memref<32x128xf32, #tpu.memory_space<vmem>>, %arg3: memref<1x128xf32, #tpu.memory_space<vmem>>, %arg4: memref<128x32xf32, #tpu.memory_space<vmem>>, %arg5: memref<1x32xf32, #tpu.memory_space<vmem>>, %arg6: memref<16x32xf32, #tpu.memory_space<vmem>>) attributes {dimension_semantics = [#tpu.dimension_semantics<parallel>], iteration_bounds = array<i64: 1>, scalar_prefetch = 0 : i64, scratch_operands = 0 : i64, tpu.core_type = #tpu.core_type<tc>, window_params = [{transform_indices = @transform_0, window_bounds = array<i64: 16, 32>}, {pipeline_mode = #tpu.pipeline_mode<synchronous>, transform_indices = @transform_1, window_bounds = array<i64: 32, 128>}, {pipeline_mode = #tpu.pipeline_mode<synchronous>, transform_indices = @transform_2, window_bounds = array<i64: 1, 128>}, {pipeline_mode = #tpu.pipeline_mode<synchronous>, transform_indices = @transform_3, window_bounds = array<i64: 128, 32>}, {pipeline_mode = #tpu.pipeline_mode<synchronous>, transform_indices = @transform_4, window_bounds = array<i64: 1, 32>}, {transform_indices = @transform_5, window_bounds = array<i64: 16, 32>}]} {
    %c0 = arith.constant 0 : index
    %c0_0 = arith.constant 0 : index
    %0 = vector.load %arg1[%c0, %c0_0] : memref<16x32xf32, #tpu.memory_space<vmem>>, vector<16x32xf32>
    %c0_1 = arith.constant 0 : index
    %c0_2 = arith.constant 0 : index
    %1 = vector.load %arg2[%c0_1, %c0_2] : memref<32x128xf32, #tpu.memory_space<vmem>>, vector<32x128xf32>
    %cst = arith.constant dense<0.000000e+00> : vector<16x128xf32>
    %2 = tpu.matmul %0, %1, %cst {dimension_numbers = #tpu.dot_dimension_numbers<[1], [0], [0], [1], [0, 0, 1, 1], [], []>} : vector<16x32xf32>, vector<32x128xf32>, vector<16x128xf32> -> vector<16x128xf32>
    %c0_3 = arith.constant 0 : index
    %c0_4 = arith.constant 0 : index
    %3 = vector.load %arg3[%c0_3, %c0_4] : memref<1x128xf32, #tpu.memory_space<vmem>>, vector<1x128xf32>
    %4 = vector.broadcast %3 : vector<1x128xf32> to vector<16x128xf32>
    %5 = arith.addf %2, %4 : vector<16x128xf32>
    %cst_5 = arith.constant 5.000000e-01 : f32
    %6 = vector.broadcast %cst_5 : f32 to vector<16x128xf32>
    %7 = arith.mulf %6, %5 : vector<16x128xf32>
    %cst_6 = arith.constant 0.707106769 : f32
    %8 = vector.broadcast %cst_6 : f32 to vector<16x128xf32>
    %9 = arith.mulf %5, %8 : vector<16x128xf32>
    %10 = math.erf %9 : vector<16x128xf32>
    %cst_7 = arith.constant 1.000000e+00 : f32
    %11 = vector.broadcast %cst_7 : f32 to vector<16x128xf32>
    %12 = arith.addf %11, %10 : vector<16x128xf32>
    %13 = arith.mulf %7, %12 : vector<16x128xf32>
    %c0_8 = arith.constant 0 : index
    %c0_9 = arith.constant 0 : index
    %14 = vector.load %arg4[%c0_8, %c0_9] : memref<128x32xf32, #tpu.memory_space<vmem>>, vector<128x32xf32>
    %cst_10 = arith.constant dense<0.000000e+00> : vector<16x32xf32>
    %15 = tpu.matmul %13, %14, %cst_10 {dimension_numbers = #tpu.dot_dimension_numbers<[1], [0], [0], [1], [0, 0, 1, 1], [], []>} : vector<16x128xf32>, vector<128x32xf32>, vector<16x32xf32> -> vector<16x32xf32>
    %c0_11 = arith.constant 0 : index
    %c0_12 = arith.constant 0 : index
    %16 = vector.load %arg5[%c0_11, %c0_12] : memref<1x32xf32, #tpu.memory_space<vmem>>, vector<1x32xf32>
    %17 = vector.broadcast %16 : vector<1x32xf32> to vector<16x32xf32>
    %18 = arith.addf %15, %17 : vector<16x32xf32>
    %cst_13 = arith.constant 0.000000e+00 : f32
    %19 = vector.broadcast %cst_13 : f32 to vector<16x32xf32>
    %20 = arith.maximumf %18, %19 : vector<16x32xf32>
    %c0_14 = arith.constant 0 : index
    %c0_15 = arith.constant 0 : index
    %21 = vector.load %arg6[%c0_14, %c0_15] : memref<16x32xf32, #tpu.memory_space<vmem>>, vector<16x32xf32>
    tpu.vector_store %arg6[%c0_14, %c0_15], %20 {strides = array<i32>} : memref<16x32xf32, #tpu.memory_space<vmem>>, vector<16x32xf32>,
    return
  }
  func.func @transform_0(%arg0: i32) -> (i32, i32) {
    %c0_i32 = arith.constant 0 : i32
    %c0_i32_0 = arith.constant 0 : i32
    return %arg0, %c0_i32 : i32, i32
  }
  func.func @transform_1(%arg0: i32) -> (i32, i32) {
    %c0_i32 = arith.constant 0 : i32
    %c0_i32_0 = arith.constant 0 : i32
    %c0_i32_1 = arith.constant 0 : i32
    return %c0_i32, %c0_i32_0 : i32, i32
  }
  func.func @transform_2(%arg0: i32) -> (i32, i32) {
    %c0_i32 = arith.constant 0 : i32
    %c0_i32_0 = arith.constant 0 : i32
    %c0_i32_1 = arith.constant 0 : i32
    return %c0_i32, %c0_i32_0 : i32, i32
  }
  func.func @transform_3(%arg0: i32) -> (i32, i32) {
    %c0_i32 = arith.constant 0 : i32
    %c0_i32_0 = arith.constant 0 : i32
    %c0_i32_1 = arith.constant 0 : i32
    return %c0_i32, %c0_i32_0 : i32, i32
  }
  func.func @transform_4(%arg0: i32) -> (i32, i32) {
    %c0_i32 = arith.constant 0 : i32
    %c0_i32_0 = arith.constant 0 : i32
    %c0_i32_1 = arith.constant 0 : i32
    return %c0_i32, %c0_i32_0 : i32, i32
  }
  func.func @transform_5(%arg0: i32) -> (i32, i32) {
    %c0_i32 = arith.constant 0 : i32
    %c0_i32_0 = arith.constant 0 : i32
    return %arg0, %c0_i32 : i32, i32
  }
}

</mosaic_0001>

<bundles_post_ra>
// kernel: tpu_custom_call.1
= control target key start
LH: loop header
LB: loop body
LE: loop exit
PB: predicated region body
PF: predicated region fallthrough
CT: control target
= control target key end

     0   :  { %vm34_vm0 = vcmask 261120   ;;  %s510_s0 = inlined_call_operand.vmem [shape: f32[16,32], index: 0, kind: input, shape index: {}]   ;;  %s511_s1 = inlined_call_operand.vmem [shape: f32[32,128], index: 1, kind: input, shape index: {}]   ;;  %s512_s2 = inlined_call_operand.vmem [shape: f32[1,128], index: 2, kind: input, shape index: {}]   ;;  %s513_s3 = inlined_call_operand.vmem [shape: f32[128,32], index: 3, kind: input, shape index: {}]   ;;  %s514_s4 = inlined_call_operand.vmem [shape: f32[1,32], index: 4, kind: input, shape index: {}]   ;;  %s515_s5 = inlined_call_operand.hbm [shape: f32[16,32], index: 5, kind: output, shape index: {}]  }
   0x1   :  { %v23_v0 = vld [vmem:[%s511_s1] sm:$0xff]  ;;  %v24_v1 = vld [vmem:[%s511_s1 + $0x8] sm:$0xff]  ;;  %v25_v2 = vld [vmem:[%s511_s1 + $0x10] sm:$0xff] }
   0x2   :  { %v318_v3 = vpack.c.bf16 %v24_v1, %v23_v0  ;;  %v26_v4 = vld [vmem:[%s511_s1 + $0x18] sm:$0xff]  ;;  %v21_v5 = vld [vmem:[%s510_s0] sm:$0xff]  ;;  %v127_v8 = vld [vmem:[%s513_s3 + $0x8] sm:$0xff] }
   0x3   :  { %v322_v6 = vpack.c.bf16 %v26_v4, %v25_v2  ;;  %280 = vmatprep.mubr.msk.f32.mxu0 %vm34_vm0, %v21_v5  ;;  %v126_v7 = vld [vmem:[%s513_s3] sm:$0xff]  ;;  %v128_v9 = vld [vmem:[%s513_s3 + $0x10] sm:$0xff]  ;;  %v129_v11 = vld [vmem:[%s513_s3 + $0x18] sm:$0xff] }
   0x4   :  { %319 = vmatprep.subr.bf16.mxu0 %v318_v3  ;;  %v326_v10 = vpack.c.bf16 %v127_v8, %v126_v7  ;;  %v330_v12 = vpack.c.bf16 %v129_v11, %v128_v9  ;;  %v130_v13 = vld [vmem:[%s513_s3 + $0x20] sm:$0xff]  ;;  %v131_v14 = vld [vmem:[%s513_s3 + $0x28] sm:$0xff] }
   0x5   :  { %321 = vmatpush3.bf16.msra.mxu0 %v318_v3 }
   0x6   :  { %10 = vsyncpa [#allocation3], 0  ;;  %323 = vmatprep.subr.bf16.mxu0 %v322_v6  ;;  %327 = vmatprep.subr.bf16.mxu1 %v326_v10  ;;  %v334_v15 = vpack.c.bf16 %v131_v14, %v130_v13  ;;  %v22_v16 = vld [vmem:[%s510_s0 + $0x8] sm:$0xff]  ;;  %v132_v17 = vld [vmem:[%s513_s3 + $0x30] sm:$0xff]  ;;  %s389_s11 = smov [#allocation2]  }
   0x7   :  { %329 = vmatpush3.bf16.msra.mxu1 %v326_v10  ;;  %v133_v18 = vld [vmem:[%s513_s3 + $0x38] sm:$0xff]  ;;  %v134_v20 = vld [vmem:[%s513_s3 + $0x40] sm:$0xff]  ;;  %v135_v21 = vld [vmem:[%s513_s3 + $0x48] sm:$0xff]  ;;  %s233_s12 = sshll.u32 %s389_s11, 4  ;;  %s234_s12 = int_to_ptr.vmem [resolvable:$true] %s233_s12 }
   0x8   :  { %331 = vmatprep.subr.bf16.mxu1 %v330_v12  ;;  %v338_v19 = vpack.c.bf16 %v133_v18, %v132_v17  ;;  %v342_v22 = vpack.c.bf16 %v135_v21, %v134_v20  ;;  %v136_v23 = vld [vmem:[%s513_s3 + $0x50] sm:$0xff]  ;;  %v137_v24 = vld [vmem:[%s513_s3 + $0x58] sm:$0xff]  ;;  %v138_v26 = vld [vmem:[%s513_s3 + $0x60] sm:$0xff]  ;;  %s365_s13 = scalar_lea.vmem %s234_s12, 256  ;;  %p370_p1 = scmp.lt.s32.totalorder %s234_s12, %s234_s12 }
   0x9   :  { %325 = vmatpush3.bf16.msra.mxu0 %v322_v6  ;;  %v346_v25 = vpack.c.bf16 %v137_v24, %v136_v23  ;;  %v139_v27 = vld [vmem:[%s513_s3 + $0x68] sm:$0xff]  ;;  %v140_v29 = vld [vmem:[%s513_s3 + $0x70] sm:$0xff]  ;;  %v141_v30 = vld [vmem:[%s513_s3 + $0x78] sm:$0xff]  ;;  %p366_p0 = scmp.ne.s32.totalorder %s234_s12, %s365_s13  ;;  %p371_p2 = scmp.lt.s32.totalorder %s365_s13, %s365_s13 }
   0xa   :  { %v350_v28 = vpack.c.bf16 %v139_v27, %v138_v26  ;;  %v354_v31 = vpack.c.bf16 %v141_v30, %v140_v29  ;;  %v244_v32 = vld [vmem:[%s512_s2] ss:$0 sm:$0xff] }
   0xb   :  { %333 = vmatpush3.bf16.msra.mxu1 %v330_v12  ;;  %v247_v47 = vld [vmem:[%s514_s4] ss:$0 sm:$0xff]  ;;  %p372_p3 = por %p371_p2, %p370_p1 }
   0xc   :  { %281 = vmatmul.mubr.msk.f32.vlgmr.msra.gmra.mrb[0].mxu0 %vm34_vm0, %v22_v16  ;;  %335 = vmatprep.subr.bf16.mxu1 %v334_v15 }
   0xd   :  { %p373_p4 = pnand %p372_p3, %p366_p0 }
   0xf   :  { %337 = vmatpush3.bf16.msra.mxu1 %v334_v15 }
  0x10   :  { %339 = vmatprep.subr.bf16.mxu1 %v338_v19 }
  0x13   :  { %341 = vmatpush3.bf16.msra.mxu1 %v338_v19 }
  0x14   :  { %343 = vmatprep.subr.bf16.mxu1 %v342_v22 }
  0x17   :  { %345 = vmatpush3.bf16.msra.mxu1 %v342_v22 }
  0x18   :  { %347 = vmatprep.subr.bf16.mxu1 %v346_v25 }
  0x1b   :  { %349 = vmatpush3.bf16.msra.mxu1 %v346_v25 }
  0x1c   :  { %351 = vmatprep.subr.bf16.mxu1 %v350_v28 }
  0x1f   :  { %353 = vmatpush3.bf16.msra.mxu1 %v350_v28 }
  0x20   :  { %355 = vmatprep.subr.bf16.mxu1 %v354_v31 }
  0x23   :  { %357 = vmatpush3.bf16.msra.mxu1 %v354_v31 }
  0xdf   :  { %v282_v33 = vpop.f32.mrb[0].mxu0 }
  0xe0   :  { %v113_v34 = vadd.f32 %v282_v33, %v244_v32  ;;  %v107_v35 = vpop.f32.mrb[1].mxu0 }
  0xe1   :  { %v108_v36 = vadd.f32 %v244_v32, %v107_v35 }
  0xe2   :  { %v119_v37 = vmul.f32 0.70710677, %v113_v34  ;;  %v117_v44 = vmul.f32 0.5, %v113_v34 }
  0xe3   :  { %v118_v38 = vmul.f32 0.70710677, %v108_v36  ;;  %v116_v42 = vmul.f32 0.5, %v108_v36 }
  0xe4   :  { %361 = verf.f32 %v119_v37 }
  0xe5   :  { %363 = verf.f32 %v118_v38 }
  0xee   :  { %v362_v39 = vpop.eup %361 }
  0xef   :  { %v364_v40 = vpop.eup %363  ;;  %v123_v41 = vadd.f32 1.0, %v362_v39 }
  0xf0   :  { %v122_v43 = vadd.f32 1.0, %v364_v40 }
  0xf1   :  { %v125_v46 = vmul.f32 %v123_v41, %v117_v44 }
  0xf2   :  { %v124_v45 = vmul.f32 %v122_v43, %v116_v42 }
  0xf4   :  { %315 = vmatprep.mubr.f32.mxu1 %v124_v45 }
  0xf5   :  { %316 = vmatmul.mubr.f32.vlgmr.msra.gmra.mrb[0].mxu1 %v125_v46 }
 0x1c8   :  { %v317_v48 = vpop.f32.mrb[0].mxu1 }
 0x1c9   :  { %v221_v49 = vadd.f32 %v317_v48, %v247_v47  ;;  %v215_v50 = vpop.f32.mrb[1].mxu1 }
 0x1ca   :  { %v216_v51 = vadd.f32 %v247_v47, %v215_v50 }
 0x1cb   :  { %v225_v52 = vmax.f32 %v221_v49, 0.0 }
 0x1cc   :  { %v224_v53 = vmax.f32 %v216_v51, 0.0 }
 0x1cd   :  { %227 = vst.msk [vmem:[#allocation2 + $0x8] sm:$0xff] %vm34_vm0, %v225_v52 }
 0x1ce   :  { %226 = vst.msk [vmem:[#allocation2] sm:$0xff] %vm34_vm0, %v224_v53 }
 0x1cf   :  { %376 = shalt.err (!%p373_p4)
}
 0x1d0   :  { %s377_s15 = scalar_lea.hbm %s515_s5, 256 }
 0x1d1   :  { %p378_p5 = scmp.ne.s32.totalorder %s515_s5, %s377_s15  ;;  %p381_p6 = scmp.lt.u32.totalorder %s377_s15, %s515_s5 }
 0x1d3   :  { %p383_p7 = pnand %p381_p6, %p378_p5 }
 0x1d5   :  { %386 = shalt.err (!%p383_p7)
}
 0x1d6   :  { %s390_s20 = smov 128   ;;  %s391_s21 = smov 8  }
 0x1d7   :  { %239 = dma.vmem_to_hbm [thread:$0]  %s234_s12, 256, %s515_s5, [#allocation3], %s390_s20, %s390_s20, %s391_s21  }
 0x1d8   :  { %387 = dma.done.wait [#allocation3], 256  }
 0x1d9   :  { %388 = vsyncadd [#allocation3], 4294967040 }
 0x1da   :  { %243 = vsyncpa [#allocation3], 1 }

</bundles_post_ra>
